<compile_context>
chip_gen: v6e
topology: v6e:2x2x1
jax: 0.10.0
libtpu: 0.0.40
codegen_flags: <defaults>
</compile_context>

<pallas_src>
import functools

import jax
import jax.numpy as jnp
from jax.experimental import pallas as pl
from jax.experimental.pallas import tpu as pltpu


def _round_up(x, m):
    return ((x + m - 1) // m) * m


def _num_tensorcores_per_chip():
    """1 for v5e/v6e (single TensorCore); 2 for v7x / megacore chips.

    Defaults to 2 when unknown: one extra tiny grid step on a 1-TC chip costs
    ~0.35us, while collapsing a 2-TC chip to one step can double kernel time.
    """
    try:
        kind = jax.devices()[0].device_kind.lower()
    except Exception:
        return 2
    if "lite" in kind or "v5e" in kind or "v6e" in kind:
        return 1
    return 2


@functools.partial(jax.jit,
                   static_argnames=("total_terminals", "max_packet_size", "bm"))
def mlp_forward(input_seq, w_ch, w1, b1, w2, b2, norm_max, norm_min, *,
                total_terminals, max_packet_size, bm=None):
    """input_seq: (B, 4) int32 [src, dest, packet_size, has_another] -> (B, out_dim) f32."""
    B = input_seq.shape[0]
    C, T, _ = w_ch.shape
    H = w1.shape[1]
    out_dim = w2.shape[1]
    TT = T * T
    f32 = jnp.float32

    # ---- B-independent parameter prep (tiny; fused by jit around the kernel) ----
    wch_flat = w_ch.astype(f32).reshape(C, TT)                               # (C, T*T)
    # Fuse W1's "combined" columns through the channel weights and fold in b1
    # (exact because each in-range one-hot column sums to exactly 1).
    m1 = jnp.dot(w1[:C, :].astype(f32).T, wch_flat,
                 preferred_element_type=f32) + b1.astype(f32)[:, None]       # (H, T*T)
    wsz = w1[C, :].astype(f32).reshape(H, 1)                                 # size column
    wan = w1[C + 1, :].astype(f32).reshape(H, 1)                             # has-another column
    scale = (norm_max - norm_min).astype(f32)
    w2t = jnp.transpose(w2.astype(f32) * scale[None, :])                     # (out, H)
    b2c = (b2.astype(f32) * scale + norm_min.astype(f32)).reshape(out_dim, 1)

    # ---- generation-aware, lane-aligned batch tiling (batch on the lane axis) ----
    n_tc = _num_tensorcores_per_chip()
    b_pad0 = _round_up(max(B, 1), 128)
    if bm is None:
        per_core = -(-b_pad0 // n_tc)                  # cdiv: aim for n_tc grid steps
        bm = min(4096, max(128, _round_up(per_core, 128)))
    bm = _round_up(min(int(bm), b_pad0), 128)
    b_pad = _round_up(b_pad0, bm)

    seq_t = jnp.transpose(input_seq.astype(jnp.int32))                       # (4, B)
    if b_pad != B:
        # Padded lanes compute garbage that is sliced off below (never reduced over).
        seq_t = jnp.pad(seq_t, ((0, 0), (0, b_pad - B)))

    inv_mps = float(1.0 / max_packet_size)
    t_const = int(total_terminals)

    def kernel(seq_ref, m1_ref, wsz_ref, wan_ref, w2t_ref, b2_ref, out_ref):
        # seq_ref: (4, bm) int32  [src, dest, size, has_another], batch on lanes
        # m1_ref : (H, T*T)       W1_combined^T @ W_ch_flat + b1     (resident)
        # wsz_ref: (H, 1)         W1 size column
        # wan_ref: (H, 1)         W1 has_another column
        # w2t_ref: (out, H)       (W2 * denorm_scale)^T
        # b2_ref : (out, 1)       b2 * denorm_scale + denorm_shift
        # out_ref: (out, bm)      denormalized prediction, batch on lanes (lane-dense)
        nbm = seq_ref.shape[1]
        src = seq_ref[0:1, :]
        dst = seq_ref[1:2, :]
        size = seq_ref[2:3, :].astype(f32) * inv_mps
        another = seq_ref[3:4, :].astype(f32)
        flat = src * t_const + dst                                           # (1, bm)
        onehot = (jax.lax.broadcasted_iota(jnp.int32, (TT, nbm), 0)
                  == flat).astype(f32)                                       # (T*T, bm)
        # one_hot(src) @ W_ch @ one_hot(dst) fused with Linear-1 (+b1): K = T*T = 256
        h = jnp.dot(m1_ref[...], onehot, preferred_element_type=f32)         # (H, bm)
        h = h + wsz_ref[...] * size + wan_ref[...] * another                 # rank-1 VPU updates
        h = jnp.maximum(h, 0.0)                                              # ReLU
        y = jnp.dot(w2t_ref[...], h, preferred_element_type=f32)             # (out, bm)
        out_ref[...] = y + b2_ref[...]

    out_t = pl.pallas_call(
        kernel,
        out_shape=jax.ShapeDtypeStruct((out_dim, b_pad), f32),
        grid=(b_pad // bm,),
        in_specs=[
            pl.BlockSpec((4, bm), lambda i: (0, i)),        # int32 seq slab (lane-dense)
            pl.BlockSpec((H, TT), lambda i: (0, 0)),        # fused W1 / W_ch / b1 (resident)
            pl.BlockSpec((H, 1), lambda i: (0, 0)),
            pl.BlockSpec((H, 1), lambda i: (0, 0)),
            pl.BlockSpec((out_dim, H), lambda i: (0, 0)),
            pl.BlockSpec((out_dim, 1), lambda i: (0, 0)),
        ],
        out_specs=pl.BlockSpec((out_dim, bm), lambda i: (0, i)),
        compiler_params=pltpu.CompilerParams(
            dimension_semantics=("parallel",)),             # batch axis shards across TCs (v7x)
    )(seq_t, m1, wsz, wan, w2t, b2c)

    # Consumers that accept the (out_dim, B) layout can take out_t[:, :B] directly.
    return out_t[:, :B].T                                   # (B, out_dim)


def mlp_reference(input_seq, w_ch, w1, b1, w2, b2, norm_max, norm_min,
                  *, total_terminals, max_packet_size):
    """Pure-JAX reference mirroring the PyTorch forward (eval mode)."""
    tt = total_terminals
    src_oh = jax.nn.one_hot(input_seq[:, 0], tt, dtype=jnp.float32)
    dst_oh = jax.nn.one_hot(input_seq[:, 1], tt, dtype=jnp.float32)
    combined = jnp.einsum("bt,cts,bs->bc", src_oh, w_ch, dst_oh)
    size = input_seq[:, 2:3].astype(jnp.float32) / max_packet_size
    another = input_seq[:, 3:4].astype(jnp.float32)
    x = jnp.concatenate([combined, size, another], axis=1)
    h = jnp.maximum(x @ w1 + b1, 0.0)
    y = h @ w2 + b2
    return y * (norm_max - norm_min) + norm_min


if __name__ == "__main__":
    # small, module-consistent shapes
    total_terminals = 16
    max_packet_size = 1500
    channels = 4
    h_dim = 32
    out_dim = 2
    B = 1024          # -> 1 grid step on v5e/v6e, 2 even steps on 2-TC chips

    key = jax.random.PRNGKey(0)
    k_seq, k_w, k_w1, k_b1, k_w2, k_b2 = jax.random.split(key, 6)

    # synthetic deterministic parameters (same shapes as the nn.Module)
    w_ch = jax.random.uniform(k_w, (channels, total_terminals, total_terminals),
                              dtype=jnp.float32, minval=0.0, maxval=1.0)
    w1 = jax.random.normal(k_w1, (channels + 2, h_dim), dtype=jnp.float32) * 0.1
    b1 = jax.random.normal(k_b1, (h_dim,), dtype=jnp.float32) * 0.1
    w2 = jax.random.normal(k_w2, (h_dim, out_dim), dtype=jnp.float32) * 0.1
    b2 = jax.random.normal(k_b2, (out_dim,), dtype=jnp.float32) * 0.1
    norm_max = jnp.array([10.0, 5.0], dtype=jnp.float32)
    norm_min = jnp.array([0.0, 1.0], dtype=jnp.float32)

    # synthetic input sequence: [src_terminal, dest_terminal, packet_size, has_another]
    ks, kd, kp, ka = jax.random.split(k_seq, 4)
    input_seq = jnp.stack([
        jax.random.randint(ks, (B,), 0, total_terminals),
        jax.random.randint(kd, (B,), 0, total_terminals),
        jax.random.randint(kp, (B,), 1, max_packet_size + 1),
        jax.random.randint(ka, (B,), 0, 2),
    ], axis=1).astype(jnp.int32)                                              # (B, 4)

    out = mlp_forward(input_seq, w_ch, w1, b1, w2, b2, norm_max, norm_min,
                      total_terminals=total_terminals,
                      max_packet_size=max_packet_size)
    out = jax.block_until_ready(out)

    ref = mlp_reference(input_seq, w_ch, w1, b1, w2, b2, norm_max, norm_min,
                        total_terminals=total_terminals,
                        max_packet_size=max_packet_size)
    assert out.shape == (B, out_dim)
    assert jnp.allclose(out, ref, atol=1e-4, rtol=1e-4)

    print("KERNEL_OK")
</pallas_src>

<mosaic_0001>
module attributes {stable_mosaic.version = 11 : i64} {
  func.func @kernel(%arg0: i32, %arg1: memref<4x512xi32, #tpu.memory_space<vmem>>, %arg2: memref<32x256xf32, #tpu.memory_space<vmem>>, %arg3: memref<32x1xf32, #tpu.memory_space<vmem>>, %arg4: memref<32x1xf32, #tpu.memory_space<vmem>>, %arg5: memref<2x32xf32, #tpu.memory_space<vmem>>, %arg6: memref<2x1xf32, #tpu.memory_space<vmem>>, %arg7: memref<2x512xf32, #tpu.memory_space<vmem>>) attributes {dimension_semantics = [#tpu.dimension_semantics<parallel>], iteration_bounds = array<i64: 2>, scalar_prefetch = 0 : i64, scratch_operands = 0 : i64, tpu.core_type = #tpu.core_type<tc>, window_params = [{transform_indices = @transform_0, window_bounds = array<i64: 4, 512>}, {pipeline_mode = #tpu.pipeline_mode<synchronous>, transform_indices = @transform_1, window_bounds = array<i64: 32, 256>}, {pipeline_mode = #tpu.pipeline_mode<synchronous>, transform_indices = @transform_2, window_bounds = array<i64: 32, 1>}, {pipeline_mode = #tpu.pipeline_mode<synchronous>, transform_indices = @transform_3, window_bounds = array<i64: 32, 1>}, {pipeline_mode = #tpu.pipeline_mode<synchronous>, transform_indices = @transform_4, window_bounds = array<i64: 2, 32>}, {pipeline_mode = #tpu.pipeline_mode<synchronous>, transform_indices = @transform_5, window_bounds = array<i64: 2, 1>}, {transform_indices = @transform_6, window_bounds = array<i64: 2, 512>}]} {
    %c0 = arith.constant 0 : index
    %c0_0 = arith.constant 0 : index
    %0 = vector.load %arg1[%c0, %c0_0] : memref<4x512xi32, #tpu.memory_space<vmem>>, vector<1x512xi32>
    %c1 = arith.constant 1 : index
    %c0_1 = arith.constant 0 : index
    %1 = vector.load %arg1[%c1, %c0_1] : memref<4x512xi32, #tpu.memory_space<vmem>>, vector<1x512xi32>
    %c2 = arith.constant 2 : index
    %c0_2 = arith.constant 0 : index
    %2 = vector.load %arg1[%c2, %c0_2] : memref<4x512xi32, #tpu.memory_space<vmem>>, vector<1x512xi32>
    %3 = arith.sitofp %2 : vector<1x512xi32> to vector<1x512xf32>
    %cst = arith.constant 6.66666659E-4 : f32
    %4 = vector.broadcast %cst : f32 to vector<1x512xf32>
    %5 = arith.mulf %3, %4 : vector<1x512xf32>
    %c3 = arith.constant 3 : index
    %c0_3 = arith.constant 0 : index
    %6 = vector.load %arg1[%c3, %c0_3] : memref<4x512xi32, #tpu.memory_space<vmem>>, vector<1x512xi32>
    %7 = arith.sitofp %6 : vector<1x512xi32> to vector<1x512xf32>
    %c16_i32 = arith.constant 16 : i32
    %8 = vector.broadcast %c16_i32 : i32 to vector<1x512xi32>
    %9 = arith.muli %0, %8 : vector<1x512xi32>
    %10 = arith.addi %9, %1 : vector<1x512xi32>
    %11 = tpu.iota {dimensions = array<i32: 0>} : vector<256x512xi32>
    %12 = vector.broadcast %10 : vector<1x512xi32> to vector<256x512xi32>
    %13 = arith.cmpi eq, %11, %12 : vector<256x512xi32>
    %14 = arith.extui %13 : vector<256x512xi1> to vector<256x512xi32>
    %15 = arith.sitofp %14 : vector<256x512xi32> to vector<256x512xf32>
    %c0_4 = arith.constant 0 : index
    %c0_5 = arith.constant 0 : index
    %16 = vector.load %arg2[%c0_4, %c0_5] : memref<32x256xf32, #tpu.memory_space<vmem>>, vector<32x256xf32>
    %cst_6 = arith.constant dense<0.000000e+00> : vector<32x512xf32>
    %17 = tpu.matmul %16, %15, %cst_6 {dimension_numbers = #tpu.dot_dimension_numbers<[1], [0], [0], [1], [0, 0, 1, 1], [], []>} : vector<32x256xf32>, vector<256x512xf32>, vector<32x512xf32> -> vector<32x512xf32>
    %c0_7 = arith.constant 0 : index
    %c0_8 = arith.constant 0 : index
    %18 = vector.load %arg3[%c0_7, %c0_8] : memref<32x1xf32, #tpu.memory_space<vmem>>, vector<32x1xf32>
    %19 = vector.broadcast %18 : vector<32x1xf32> to vector<32x512xf32>
    %20 = vector.broadcast %5 : vector<1x512xf32> to vector<32x512xf32>
    %21 = arith.mulf %19, %20 : vector<32x512xf32>
    %22 = arith.addf %17, %21 : vector<32x512xf32>
    %c0_9 = arith.constant 0 : index
    %c0_10 = arith.constant 0 : index
    %23 = vector.load %arg4[%c0_9, %c0_10] : memref<32x1xf32, #tpu.memory_space<vmem>>, vector<32x1xf32>
    %24 = vector.broadcast %23 : vector<32x1xf32> to vector<32x512xf32>
    %25 = vector.broadcast %7 : vector<1x512xf32> to vector<32x512xf32>
    %26 = arith.mulf %24, %25 : vector<32x512xf32>
    %27 = arith.addf %22, %26 : vector<32x512xf32>
    %cst_11 = arith.constant 0.000000e+00 : f32
    %28 = vector.broadcast %cst_11 : f32 to vector<32x512xf32>
    %29 = arith.maximumf %27, %28 : vector<32x512xf32>
    %c0_12 = arith.constant 0 : index
    %c0_13 = arith.constant 0 : index
    %30 = vector.load %arg5[%c0_12, %c0_13] : memref<2x32xf32, #tpu.memory_space<vmem>>, vector<2x32xf32>
    %cst_14 = arith.constant dense<0.000000e+00> : vector<2x512xf32>
    %31 = tpu.matmul %30, %29, %cst_14 {dimension_numbers = #tpu.dot_dimension_numbers<[1], [0], [0], [1], [0, 0, 1, 1], [], []>} : vector<2x32xf32>, vector<32x512xf32>, vector<2x512xf32> -> vector<2x512xf32>
    %c0_15 = arith.constant 0 : index
    %c0_16 = arith.constant 0 : index
    %32 = vector.load %arg6[%c0_15, %c0_16] : memref<2x1xf32, #tpu.memory_space<vmem>>, vector<2x1xf32>
    %33 = vector.broadcast %32 : vector<2x1xf32> to vector<2x512xf32>
    %34 = arith.addf %31, %33 : vector<2x512xf32>
    %c0_17 = arith.constant 0 : index
    %c0_18 = arith.constant 0 : index
    %35 = vector.load %arg7[%c0_17, %c0_18] : memref<2x512xf32, #tpu.memory_space<vmem>>, vector<2x512xf32>
    tpu.vector_store %arg7[%c0_17, %c0_18], %34 {strides = array<i32>} : memref<2x512xf32, #tpu.memory_space<vmem>>, vector<2x512xf32>,
    return
  }
  func.func @transform_0(%arg0: i32) -> (i32, i32) {
    %c0_i32 = arith.constant 0 : i32
    %c0_i32_0 = arith.constant 0 : i32
    return %c0_i32, %arg0 : i32, i32
  }
  func.func @transform_1(%arg0: i32) -> (i32, i32) {
    %c0_i32 = arith.constant 0 : i32
    %c0_i32_0 = arith.constant 0 : i32
    %c0_i32_1 = arith.constant 0 : i32
    return %c0_i32, %c0_i32_0 : i32, i32
  }
  func.func @transform_2(%arg0: i32) -> (i32, i32) {
    %c0_i32 = arith.constant 0 : i32
    %c0_i32_0 = arith.constant 0 : i32
    %c0_i32_1 = arith.constant 0 : i32
    return %c0_i32, %c0_i32_0 : i32, i32
  }
  func.func @transform_3(%arg0: i32) -> (i32, i32) {
    %c0_i32 = arith.constant 0 : i32
    %c0_i32_0 = arith.constant 0 : i32
    %c0_i32_1 = arith.constant 0 : i32
    return %c0_i32, %c0_i32_0 : i32, i32
  }
  func.func @transform_4(%arg0: i32) -> (i32, i32) {
    %c0_i32 = arith.constant 0 : i32
    %c0_i32_0 = arith.constant 0 : i32
    %c0_i32_1 = arith.constant 0 : i32
    return %c0_i32, %c0_i32_0 : i32, i32
  }
  func.func @transform_5(%arg0: i32) -> (i32, i32) {
    %c0_i32 = arith.constant 0 : i32
    %c0_i32_0 = arith.constant 0 : i32
    %c0_i32_1 = arith.constant 0 : i32
    return %c0_i32, %c0_i32_0 : i32, i32
  }
  func.func @transform_6(%arg0: i32) -> (i32, i32) {
    %c0_i32 = arith.constant 0 : i32
    %c0_i32_0 = arith.constant 0 : i32
    return %c0_i32, %arg0 : i32, i32
  }
}

</mosaic_0001>

<bundles_post_ra>
// kernel: mlp_forward.1
= control target key start
LH: loop header
LB: loop body
LE: loop exit
PB: predicated region body
PF: predicated region fallthrough
CT: control target
= control target key end

     0   :  { %11 = vsyncpa [#allocation3], 0  ;;  %s2193_s0 = inlined_call_operand.vmem [shape: s32[4,1024], index: 0, kind: input, shape index: {}]   ;;  %s2194_s1 = inlined_call_operand.vmem [shape: f32[32,256], index: 1, kind: input, shape index: {}]   ;;  %s2195_s2 = inlined_call_operand.vmem [shape: f32[32,1], index: 2, kind: input, shape index: {}]   ;;  %s2196_s3 = inlined_call_operand.vmem [shape: f32[32,1], index: 3, kind: input, shape index: {}]   ;;  %s2197_s4 = inlined_call_operand.vmem [shape: f32[2,32], index: 4, kind: input, shape index: {}]   ;;  %s2198_s5 = inlined_call_operand.vmem [shape: f32[2,1], index: 5, kind: input, shape index: {}]   ;;  %s2199_s6 = inlined_call_operand.hbm [shape: f32[2,1024], index: 6, kind: output, shape index: {}]  }
   0x1   :  { %13 = vsyncpa [#allocation3 + $0x1], 0  ;;  %s1709_s21 = smov 0   ;;  %s1711_s22 = smov 0  }
   0x2   :  { %s1713_s23 = smov 0   ;;  %s1715_s24 = smov 0  }
   0x3 LB: > { %s1730_s25 = sadd.s32 4294967295, %s1667_s24   ;;  %s1288_s26 = sadd.s32 4294967294, %s1667_s24   ;;  %s1667_s24 = sphi %s1715_s24, %s2212_s24   ;;  %s1663_s23 = sphi %s1713_s23, %s2211_s23   ;;  %s1659_s22 = sphi %s1711_s22, %s2210_s22   ;;  %s1655_s21 = sphi %s1709_s21, %s2209_s21  }
   0x4   : > { %s1734_s27 = sadd.s32 1, %s1667_s24   ;;  %s157_s28 = sadd.s32 1, %s1663_s23 }
   0x5   : > { %s154_s29 = ssub.s32 %s1667_s24, %s1734_s27  ;;  %p167_p0 = scmp.ne.s32.totalorder %s1663_s23, %s1659_s22 }
   0x6   : > { %p155_p1 = scmp.eq.s32.totalorder %s154_s29, 0  ;;  %p168_p2 = scmp.eq.s32.totalorder %s1730_s25, 1 }
   0x7   : > { %p173_p3 = scmp.ne.s32.totalorder %s1659_s22, %s1655_s21  ;;  %p174_p4 = scmp.eq.s32.totalorder %s1288_s26, 1 }
   0x8   : > { %s1745_s30 = scalar_select %p155_p1, %s1663_s23, %s157_s28  }
   0x9   : > { %p1747_p5 = por %p168_p2, %p167_p0  ;;  %p1751_p6 = por %p174_p4, %p173_p3 }
   0xa   : > { %p1291_p7 = scmp.ge.s32.totalorder %s1667_s24, 1  ;;  %p216_p8 = scmp.lt.s32.totalorder %s1667_s24, 3 }
   0xc   : > { %p217_p9 = pnand %p1291_p7, %p216_p8 }
   0xe   : > { %220 = sbr.rel (%p217_p9) target bundleno = 534 (0x216), region = 44 }
  0x13   : > { %s1293_s9 = sshll.u32 %s1730_s25, 2  ;;  %v265_v0 = vlaneseq  ;;  %v699_v1 = vld [vmem:[%s2194_s1 + $0x8] sm:$0xff]  ;;  %v1669_v3 = vmov 0   ;;  %v948_v4 = vld [vmem:[%s2196_s3 + $0x18] sm:$0xff]  ;;  %v708_v7 = vld [vmem:[%s2195_s2 + $0x10] sm:$0xff]  ;;  %v1670_v26 = vmov 1.0  }
  0x14   : > { %p247_p10 = scmp.lt.s32.totalorder %s1293_s9, 7  ;;  %831 = vmatprep.mubr.f32.mxu0 %v699_v1  ;;  %920 = vmatprep.mubr.f32.mxu1 %v699_v1  ;;  %v709_v5 = vld [vmem:[%s2195_s2 + $0x18] sm:$0xff]  ;;  %v707_v6 = vld [vmem:[%s2195_s2 + $0x8] sm:$0xff]  ;;  %v706_v15 = vld [vmem:[%s2195_s2] sm:$0xff]  ;;  %s243_s20 = sand.u32 1, %s1659_s22  }
  0x15   : > { %v1761_v2 = vshrl.u32 %v265_v0, 7  ;;  %1606 = vset.pattern.permute.xlu1 %v1669_v3  ;;  %1605 = vset.pattern.permute.xlu0 %v1669_v3  ;;  %v947_v16 = vld [vmem:[%s2196_s3 + $0x10] sm:$0xff]  ;;  %v698_v54 = vld [vmem:[%s2194_s1] sm:$0xff]  ;;  %v701_v55 = vld [vmem:[%s2194_s1 + $0x18] sm:$0xff]  ;;  %v1671_v0 = vmov 0.0   ;;  %s1292_s26 = sshll.u32 %s243_s20, 3 }
  0x16   : > { %s2214_s9 = smov (!%p247_p10, %s1293_s9), 7  ;;  %966 = vperm.xlu1 %1606, %v948_v4   ;;  %727 = vperm.xlu0 %1605, %v709_v5   ;;  %v945_v56 = vld [vmem:[%s2196_s3] sm:$0xff]  ;;  %v946_v57 = vld [vmem:[%s2196_s3 + $0x8] sm:$0xff]  ;;  %v700_v58 = vld [vmem:[%s2194_s1 + $0x10] sm:$0xff]  ;;  %s1561_s28 = sshll.u32 %s1730_s25, 7 }
  0x17   : > { %2203 = vst [vmem:[#allocation5_spill] sm:$0xff] %v1761_v2  ;;  %s1294_s18 = sshll.u32 %s2214_s9, 2  ;;  %v1781_v8 = vsub.s32 1, %v1761_v2  ;;  %v1786_v12 = vsub.s32 3, %v1761_v2  ;;  %v1789_v13 = vsub.s32 0, %v1761_v2  ;;  %v1792_v14 = vsub.s32 2, %v1761_v2  ;;  %s1227_s13 = scalar_lea.hbm %s2199_s6, %s1561_s28 }
  0x18   : > { %s1778_s29 = scalar_lea.vmem %s2193_s0, %s1294_s18  ;;  %v281_v18 = vadd.s32 120, %v1761_v2  ;;  %v280_v19 = vadd.s32 112, %v1761_v2  ;;  %v279_v20 = vadd.s32 104, %v1761_v2  ;;  %v278_v25 = vadd.s32 96, %v1761_v2  ;;  %v703_v59 = vld [vmem:[%s2194_s1 + $0x28] sm:$0xff]  ;;  %v702_v61 = vld [vmem:[%s2194_s1 + $0x20] sm:$0xff] }
  0x19   : > { %v253_v9 = vld [vmem:[%s1778_s29] ss:$4 sm:$0xf]  ;;  %v1295_v10 = vld [vmem:[%s1778_s29 + $0x1] ss:$4 sm:$0xf] }
  0x1a   : > { %717 = vperm.xlu1 %1606, %v707_v6   ;;  %v263_v11 = vmul.u32 16, %v253_v9  ;;  %722 = vperm.xlu0 %1605, %v708_v7   ;;  %v277_v27 = vadd.s32 88, %v1761_v2  ;;  %v276_v28 = vadd.s32 80, %v1761_v2  ;;  %v275_v29 = vadd.s32 72, %v1761_v2  ;;  %v1039_v60 = vld [vmem:[%s2198_s5] sm:$0x3] }
  0x1b   : > { %v274_v30 = vadd.s32 64, %v1761_v2  ;;  %v273_v31 = vadd.s32 56, %v1761_v2  ;;  %v272_v32 = vadd.s32 48, %v1761_v2  ;;  %v271_v33 = vadd.s32 40, %v1761_v2  ;;  %v705_v62 = vld [vmem:[%s2194_s1 + $0x38] sm:$0xff]  ;;  %v704_v63 = vld [vmem:[%s2194_s1 + $0x30] sm:$0xff] }
  0x1c   : > { %v264_v17 = vadd.s32 %v1295_v10, %v263_v11  ;;  %v270_v34 = vadd.s32 32, %v1761_v2  ;;  %v269_v35 = vadd.s32 24, %v1761_v2  ;;  %v268_v36 = vadd.s32 16, %v1761_v2  ;;  %v1296_v3 = vld [vmem:[%s1778_s29 + $0x2] ss:$4 sm:$0xf] }
  0x1d   : > { %v267_v37 = vadd.s32 8, %v1761_v2  ;;  %v297_v38 = vadd.s32 248, %v1761_v2  ;;  %v296_v39 = vadd.s32 240, %v1761_v2  ;;  %v295_v40 = vadd.s32 232, %v1761_v2  ;;  %s245_s9 = scalar_lea.vmem [#allocation2], %s1292_s26  ;;  %s1215_s14 = scalar_lea.sflag [#allocation3], %s243_s20 }
  0x1e   : > { %712 = vperm.xlu1 %1606, %v706_v15   ;;  %v1804_v21 = vrot.slane %v264_v17, %v1781_v8  ;;  %v1807_v22 = vrot.slane %v264_v17, %v1786_v12  ;;  %v1810_v23 = vrot.slane %v264_v17, %v1789_v13  ;;  %v1813_v24 = vrot.slane %v264_v17, %v1792_v14  ;;  %v1297_v7 = vld [vmem:[%s1778_s29 + $0x3] ss:$4 sm:$0xf]  ;;  %s1229_s10 = sshll.u32 %s245_s9, 4  ;;  %s1673_s16 = smov [#allocation2]   ;;  %s1230_s10 = int_to_ptr.vmem [resolvable:$true] %s1229_s10 }
  0x1f   : > { %961 = vperm.xlu0 %1605, %v947_v16   ;;  %v294_v41 = vadd.s32 224, %v1761_v2  ;;  %v293_v42 = vadd.s32 216, %v1761_v2  ;;  %v292_v43 = vadd.s32 208, %v1761_v2  ;;  %v291_v44 = vadd.s32 200, %v1761_v2  ;;  %s1607_s15 = scalar_lea.vmem %s1230_s10, 128  ;;  %s1611_s17 = sshll.u32 %s1673_s16, 4  ;;  %s1612_s17 = int_to_ptr.vmem [resolvable:$false] %s1611_s17 }
  0x20   : > { %vm375_vm0 = vcmp.eq.s32.totalorder %v281_v18, %v1804_v21  ;;  %vm377_vm1 = vcmp.eq.s32.totalorder %v281_v18, %v1807_v22  ;;  %vm374_vm2 = vcmp.eq.s32.totalorder %v281_v18, %v1810_v23  ;;  %vm376_vm3 = vcmp.eq.s32.totalorder %v281_v18, %v1813_v24  ;;  %p1608_p11 = scmp.ne.s32.totalorder %s1230_s10, %s1607_s15  ;;  %s1613_s25 = scalar_lea.vmem %s1612_s17, 256 }
  0x21   : > { %1426 = vmatprep.subr.msk.mxu0 %vm375_vm0, %v1670_v26  ;;  %1490 = vmatprep.subr.msk.mxu1 %vm377_vm1, %v1670_v26  ;;  %vm371_vm4 = vcmp.eq.s32.totalorder %v280_v19, %v1804_v21  ;;  %vm373_vm5 = vcmp.eq.s32.totalorder %v280_v19, %v1807_v22  ;;  %vm370_vm6 = vcmp.eq.s32.totalorder %v280_v19, %v1810_v23  ;;  %v290_v45 = vadd.s32 192, %v1761_v2  ;;  %p1614_p0 = scmp.lt.s32.totalorder %s1230_s10, %s1612_s17  ;;  %p1615_p1 = scmp.lt.s32.totalorder %s1613_s25, %s1607_s15 }
  0x22   : > { %1427 = vmatpush1.msk.msra.mxu0 %vm374_vm2, %v1670_v26  ;;  %1491 = vmatpush1.msk.msra.mxu1 %vm376_vm3, %v1670_v26  ;;  %vm372_vm7 = vcmp.eq.s32.totalorder %v280_v19, %v1813_v24  ;;  %vm367_vm8 = vcmp.eq.s32.totalorder %v279_v20, %v1804_v21  ;;  %vm369_vm9 = vcmp.eq.s32.totalorder %v279_v20, %v1807_v22  ;;  %v289_v46 = vadd.s32 184, %v1761_v2  ;;  %p1609_p12 = pnand %p1608_p11, %p1747_p5 }
  0x23   : > { %1428 = vmatprep.subr.msk.mxu0 %vm371_vm4, %v1670_v26  ;;  %1492 = vmatprep.subr.msk.mxu1 %vm373_vm5, %v1670_v26  ;;  %vm366_vm10 = vcmp.eq.s32.totalorder %v279_v20, %v1810_v23  ;;  %vm368_vm11 = vcmp.eq.s32.totalorder %v279_v20, %v1813_v24  ;;  %vm363_vm12 = vcmp.eq.s32.totalorder %v278_v25, %v1804_v21  ;;  %v288_v47 = vadd.s32 176, %v1761_v2  ;;  %p1616_p2 = por %p1615_p1, %p1614_p0 }
  0x24   : > { %1429 = vmatpush1.msk.msra.mxu0 %vm370_vm6, %v1670_v26  ;;  %1493 = vmatpush1.msk.msra.mxu1 %vm372_vm7, %v1670_v26  ;;  %vm365_vm13 = vcmp.eq.s32.totalorder %v278_v25, %v1807_v22  ;;  %vm362_vm14 = vcmp.eq.s32.totalorder %v278_v25, %v1810_v23  ;;  %vm364_vm15 = vcmp.eq.s32.totalorder %v278_v25, %v1813_v24  ;;  %v287_v48 = vadd.s32 168, %v1761_v2  ;;  %p1610_p13 = pneg %p1609_p12 }
  0x25   : > { %1430 = vmatprep.subr.msk.mxu0 %vm367_vm8, %v1670_v26  ;;  %1494 = vmatprep.subr.msk.mxu1 %vm369_vm9, %v1670_v26  ;;  %vm359_vm0 = vcmp.eq.s32.totalorder %v277_v27, %v1804_v21  ;;  %vm361_vm1 = vcmp.eq.s32.totalorder %v277_v27, %v1807_v22  ;;  %vm358_vm2 = vcmp.eq.s32.totalorder %v277_v27, %v1810_v23  ;;  %v286_v49 = vadd.s32 160, %v1761_v2 }
  0x26   : > { %1431 = vmatpush1.msk.msra.mxu0 %vm366_vm10, %v1670_v26  ;;  %1495 = vmatpush1.msk.msra.mxu1 %vm368_vm11, %v1670_v26  ;;  %vm360_vm3 = vcmp.eq.s32.totalorder %v277_v27, %v1813_v24  ;;  %vm355_vm4 = vcmp.eq.s32.totalorder %v276_v28, %v1804_v21  ;;  %vm357_vm5 = vcmp.eq.s32.totalorder %v276_v28, %v1807_v22  ;;  %v285_v50 = vadd.s32 152, %v1761_v2  ;;  %p1617_p3 = pnand %p1616_p2, %p1610_p13 }
  0x27   : > { %1432 = vmatprep.subr.msk.mxu0 %vm363_vm12, %v1670_v26  ;;  %1496 = vmatprep.subr.msk.mxu1 %vm365_vm13, %v1670_v26  ;;  %vm354_vm6 = vcmp.eq.s32.totalorder %v276_v28, %v1810_v23  ;;  %vm356_vm7 = vcmp.eq.s32.totalorder %v276_v28, %v1813_v24  ;;  %vm351_vm8 = vcmp.eq.s32.totalorder %v275_v29, %v1804_v21  ;;  %v284_v51 = vadd.s32 144, %v1761_v2 }
  0x28   : > { %1433 = vmatpush1.msk.msra.mxu0 %vm362_vm14, %v1670_v26  ;;  %1497 = vmatpush1.msk.msra.mxu1 %vm364_vm15, %v1670_v26  ;;  %vm353_vm9 = vcmp.eq.s32.totalorder %v275_v29, %v1807_v22  ;;  %vm350_vm10 = vcmp.eq.s32.totalorder %v275_v29, %v1810_v23  ;;  %vm352_vm11 = vcmp.eq.s32.totalorder %v275_v29, %v1813_v24  ;;  %v283_v52 = vadd.s32 136, %v1761_v2 }
  0x29   : > { %1434 = vmatprep.subr.msk.mxu0 %vm359_vm0, %v1670_v26  ;;  %1498 = vmatprep.subr.msk.mxu1 %vm361_vm1, %v1670_v26  ;;  %vm347_vm12 = vcmp.eq.s32.totalorder %v274_v30, %v1804_v21  ;;  %vm349_vm13 = vcmp.eq.s32.totalorder %v274_v30, %v1807_v22  ;;  %vm346_vm14 = vcmp.eq.s32.totalorder %v274_v30, %v1810_v23  ;;  %v282_v53 = vadd.s32 128, %v1761_v2 }
  0x2a   : > { %1435 = vmatpush1.msk.msra.mxu0 %vm358_vm2, %v1670_v26  ;;  %1499 = vmatpush1.msk.msra.mxu1 %vm360_vm3, %v1670_v26  ;;  %vm348_vm15 = vcmp.eq.s32.totalorder %v274_v30, %v1813_v24  ;;  %vm343_vm0 = vcmp.eq.s32.totalorder %v273_v31, %v1804_v21  ;;  %vm345_vm1 = vcmp.eq.s32.totalorder %v273_v31, %v1807_v22  ;;  %v258_v5 = vcvt.s32.f32 %v1296_v3 }
  0x2b   : > { %1436 = vmatprep.subr.msk.mxu0 %vm355_vm4, %v1670_v26  ;;  %1500 = vmatprep.subr.msk.mxu1 %vm357_vm5, %v1670_v26  ;;  %vm342_vm2 = vcmp.eq.s32.totalorder %v273_v31, %v1810_v23  ;;  %vm344_vm3 = vcmp.eq.s32.totalorder %v273_v31, %v1813_v24  ;;  %vm339_vm4 = vcmp.eq.s32.totalorder %v272_v32, %v1804_v21  ;;  %v262_v11 = vcvt.s32.f32 %v1297_v7 }
  0x2c   : > { %1437 = vmatpush1.msk.msra.mxu0 %vm354_vm6, %v1670_v26  ;;  %1501 = vmatpush1.msk.msra.mxu1 %vm356_vm7, %v1670_v26  ;;  %vm341_vm5 = vcmp.eq.s32.totalorder %v272_v32, %v1807_v22  ;;  %vm338_vm6 = vcmp.eq.s32.totalorder %v272_v32, %v1810_v23  ;;  %vm340_vm7 = vcmp.eq.s32.totalorder %v272_v32, %v1813_v24  ;;  %v259_v9 = vmul.f32 0.00066666666, %v258_v5 }
  0x2d   : > { %1438 = vmatprep.subr.msk.mxu0 %vm351_vm8, %v1670_v26  ;;  %1502 = vmatprep.subr.msk.mxu1 %vm353_vm9, %v1670_v26  ;;  %vm335_vm8 = vcmp.eq.s32.totalorder %v271_v33, %v1804_v21  ;;  %vm337_vm9 = vcmp.eq.s32.totalorder %v271_v33, %v1807_v22  ;;  %v977_v25 = vrot.slane %v262_v11, %v1781_v8 }
  0x2e   : > { %1439 = vmatpush1.msk.msra.mxu0 %vm350_vm10, %v1670_v26  ;;  %1503 = vmatpush1.msk.msra.mxu1 %vm352_vm11, %v1670_v26  ;;  %vm334_vm10 = vcmp.eq.s32.totalorder %v271_v33, %v1810_v23  ;;  %vm336_vm11 = vcmp.eq.s32.totalorder %v271_v33, %v1813_v24  ;;  %v734_v18 = vrot.slane %v259_v9, %v1789_v13 }
  0x2f   : > { %1440 = vmatprep.subr.msk.mxu0 %vm347_vm12, %v1670_v26  ;;  %1504 = vmatprep.subr.msk.mxu1 %vm349_vm13, %v1670_v26  ;;  %vm331_vm12 = vcmp.eq.s32.totalorder %v270_v34, %v1804_v21  ;;  %vm333_vm13 = vcmp.eq.s32.totalorder %v270_v34, %v1807_v22  ;;  %v742_v19 = vrot.slane %v259_v9, %v1792_v14 }
  0x30   : > { %1441 = vmatpush1.msk.msra.mxu0 %vm346_vm14, %v1670_v26  ;;  %1505 = vmatpush1.msk.msra.mxu1 %vm348_vm15, %v1670_v26  ;;  %vm330_vm14 = vcmp.eq.s32.totalorder %v270_v34, %v1810_v23  ;;  %vm332_vm15 = vcmp.eq.s32.totalorder %v270_v34, %v1813_v24  ;;  %v738_v20 = vrot.slane %v259_v9, %v1781_v8 }
  0x31   : > { %1442 = vmatprep.subr.msk.mxu0 %vm343_vm0, %v1670_v26  ;;  %1506 = vmatprep.subr.msk.mxu1 %vm345_vm1, %v1670_v26  ;;  %vm327_vm0 = vcmp.eq.s32.totalorder %v269_v35, %v1804_v21  ;;  %vm329_vm1 = vcmp.eq.s32.totalorder %v269_v35, %v1807_v22  ;;  %v985_v27 = vrot.slane %v262_v11, %v1786_v12 }
  0x32   : > { %1443 = vmatpush1.msk.msra.mxu0 %vm342_vm2, %v1670_v26  ;;  %1507 = vmatpush1.msk.msra.mxu1 %vm344_vm3, %v1670_v26  ;;  %vm326_vm2 = vcmp.eq.s32.totalorder %v269_v35, %v1810_v23  ;;  %vm328_vm3 = vcmp.eq.s32.totalorder %v269_v35, %v1813_v24 }
  0x33   : > { %1444 = vmatprep.subr.msk.mxu0 %vm339_vm4, %v1670_v26  ;;  %1508 = vmatprep.subr.msk.mxu1 %vm341_vm5, %v1670_v26  ;;  %vm323_vm4 = vcmp.eq.s32.totalorder %v268_v36, %v1804_v21  ;;  %vm325_vm5 = vcmp.eq.s32.totalorder %v268_v36, %v1807_v22 }
  0x34   : > { %1445 = vmatpush1.msk.msra.mxu0 %vm338_vm6, %v1670_v26  ;;  %1509 = vmatpush1.msk.msra.mxu1 %vm340_vm7, %v1670_v26  ;;  %vm322_vm6 = vcmp.eq.s32.totalorder %v268_v36, %v1810_v23  ;;  %vm324_vm7 = vcmp.eq.s32.totalorder %v268_v36, %v1813_v24 }
  0x35   : > { %1446 = vmatprep.subr.msk.mxu0 %vm335_vm8, %v1670_v26  ;;  %1510 = vmatprep.subr.msk.mxu1 %vm337_vm9, %v1670_v26  ;;  %vm319_vm8 = vcmp.eq.s32.totalorder %v267_v37, %v1804_v21  ;;  %vm321_vm9 = vcmp.eq.s32.totalorder %v267_v37, %v1807_v22 }
  0x36   : > { %1447 = vmatpush1.msk.msra.mxu0 %vm334_vm10, %v1670_v26  ;;  %1511 = vmatpush1.msk.msra.mxu1 %vm336_vm11, %v1670_v26  ;;  %vm318_vm10 = vcmp.eq.s32.totalorder %v267_v37, %v1810_v23  ;;  %vm320_vm11 = vcmp.eq.s32.totalorder %v267_v37, %v1813_v24 }
  0x37   : > { %1448 = vmatprep.subr.msk.mxu0 %vm331_vm12, %v1670_v26  ;;  %1512 = vmatprep.subr.msk.mxu1 %vm333_vm13, %v1670_v26  ;;  %vm315_vm12 = vcmp.eq.s32.totalorder %v1761_v2, %v1804_v21  ;;  %vm317_vm13 = vcmp.eq.s32.totalorder %v1761_v2, %v1807_v22 }
  0x38   : > { %1449 = vmatpush1.msk.msra.mxu0 %vm330_vm14, %v1670_v26  ;;  %1513 = vmatpush1.msk.msra.mxu1 %vm332_vm15, %v1670_v26  ;;  %vm314_vm14 = vcmp.eq.s32.totalorder %v1761_v2, %v1810_v23  ;;  %vm316_vm15 = vcmp.eq.s32.totalorder %v1761_v2, %v1813_v24 }
  0x39   : > { %1450 = vmatprep.subr.msk.mxu0 %vm327_vm0, %v1670_v26  ;;  %1514 = vmatprep.subr.msk.mxu1 %vm329_vm1, %v1670_v26  ;;  %vm439_vm0 = vcmp.eq.s32.totalorder %v297_v38, %v1804_v21  ;;  %vm441_vm1 = vcmp.eq.s32.totalorder %v297_v38, %v1807_v22 }
  0x3a   : > { %1451 = vmatpush1.msk.msra.mxu0 %vm326_vm2, %v1670_v26  ;;  %1515 = vmatpush1.msk.msra.mxu1 %vm328_vm3, %v1670_v26  ;;  %vm438_vm2 = vcmp.eq.s32.totalorder %v297_v38, %v1810_v23  ;;  %vm440_vm3 = vcmp.eq.s32.totalorder %v297_v38, %v1813_v24 }
  0x3b   : > { %1452 = vmatprep.subr.msk.mxu0 %vm323_vm4, %v1670_v26  ;;  %1516 = vmatprep.subr.msk.mxu1 %vm325_vm5, %v1670_v26  ;;  %vm435_vm4 = vcmp.eq.s32.totalorder %v296_v39, %v1804_v21  ;;  %vm437_vm5 = vcmp.eq.s32.totalorder %v296_v39, %v1807_v22 }
  0x3c   : > { %1453 = vmatpush1.msk.msra.mxu0 %vm322_vm6, %v1670_v26  ;;  %1517 = vmatpush1.msk.msra.mxu1 %vm324_vm7, %v1670_v26  ;;  %vm434_vm6 = vcmp.eq.s32.totalorder %v296_v39, %v1810_v23  ;;  %vm436_vm7 = vcmp.eq.s32.totalorder %v296_v39, %v1813_v24 }
  0x3d   : > { %1454 = vmatprep.subr.msk.mxu0 %vm319_vm8, %v1670_v26  ;;  %1518 = vmatprep.subr.msk.mxu1 %vm321_vm9, %v1670_v26  ;;  %vm431_vm8 = vcmp.eq.s32.totalorder %v295_v40, %v1804_v21  ;;  %vm433_vm9 = vcmp.eq.s32.totalorder %v295_v40, %v1807_v22 }
  0x3e   : > { %1455 = vmatpush1.msk.msra.mxu0 %vm318_vm10, %v1670_v26  ;;  %1519 = vmatpush1.msk.msra.mxu1 %vm320_vm11, %v1670_v26  ;;  %vm430_vm10 = vcmp.eq.s32.totalorder %v295_v40, %v1810_v23  ;;  %vm432_vm11 = vcmp.eq.s32.totalorder %v295_v40, %v1813_v24 }
  0x3f   : > { %1456 = vmatprep.subr.msk.mxu0 %vm315_vm12, %v1670_v26  ;;  %1520 = vmatprep.subr.msk.mxu1 %vm317_vm13, %v1670_v26  ;;  %vm427_vm12 = vcmp.eq.s32.totalorder %v294_v41, %v1804_v21  ;;  %vm429_vm13 = vcmp.eq.s32.totalorder %v294_v41, %v1807_v22 }
  0x40   : > { %1457 = vmatpush1.msk.msra.mxu0 %vm314_vm14, %v1670_v26  ;;  %1521 = vmatpush1.msk.msra.mxu1 %vm316_vm15, %v1670_v26  ;;  %vm426_vm14 = vcmp.eq.s32.totalorder %v294_v41, %v1810_v23  ;;  %vm428_vm15 = vcmp.eq.s32.totalorder %v294_v41, %v1813_v24 }
  0x41   : > { %1458 = vmatprep.subr.msk.mxu0 %vm439_vm0, %v1670_v26  ;;  %1522 = vmatprep.subr.msk.mxu1 %vm441_vm1, %v1670_v26  ;;  %vm423_vm0 = vcmp.eq.s32.totalorder %v293_v42, %v1804_v21  ;;  %vm425_vm1 = vcmp.eq.s32.totalorder %v293_v42, %v1807_v22 }
  0x42   : > { %1459 = vmatpush2.msk.msra.mxu0 %vm438_vm2, %v1670_v26  ;;  %1523 = vmatpush2.msk.msra.mxu1 %vm440_vm3, %v1670_v26  ;;  %vm422_vm2 = vcmp.eq.s32.totalorder %v293_v42, %v1810_v23  ;;  %vm424_vm3 = vcmp.eq.s32.totalorder %v293_v42, %v1813_v24 }
  0x43   : > { %1460 = vmatprep.subr.msk.mxu0 %vm435_vm4, %v1670_v26  ;;  %1524 = vmatprep.subr.msk.mxu1 %vm437_vm5, %v1670_v26  ;;  %vm419_vm4 = vcmp.eq.s32.totalorder %v292_v43, %v1804_v21  ;;  %vm421_vm5 = vcmp.eq.s32.totalorder %v292_v43, %v1807_v22 }
  0x44   : > { %1461 = vmatpush2.msk.msra.mxu0 %vm434_vm6, %v1670_v26  ;;  %1525 = vmatpush2.msk.msra.mxu1 %vm436_vm7, %v1670_v26  ;;  %vm418_vm6 = vcmp.eq.s32.totalorder %v292_v43, %v1810_v23  ;;  %vm420_vm7 = vcmp.eq.s32.totalorder %v292_v43, %v1813_v24 }
  0x45   : > { %1462 = vmatprep.subr.msk.mxu0 %vm431_vm8, %v1670_v26  ;;  %1526 = vmatprep.subr.msk.mxu1 %vm433_vm9, %v1670_v26  ;;  %vm415_vm8 = vcmp.eq.s32.totalorder %v291_v44, %v1804_v21  ;;  %vm417_vm9 = vcmp.eq.s32.totalorder %v291_v44, %v1807_v22 }
  0x46   : > { %1463 = vmatpush2.msk.msra.mxu0 %vm430_vm10, %v1670_v26  ;;  %1527 = vmatpush2.msk.msra.mxu1 %vm432_vm11, %v1670_v26  ;;  %vm414_vm10 = vcmp.eq.s32.totalorder %v291_v44, %v1810_v23  ;;  %vm416_vm11 = vcmp.eq.s32.totalorder %v291_v44, %v1813_v24 }
  0x47   : > { %1464 = vmatprep.subr.msk.mxu0 %vm427_vm12, %v1670_v26  ;;  %1528 = vmatprep.subr.msk.mxu1 %vm429_vm13, %v1670_v26  ;;  %vm411_vm12 = vcmp.eq.s32.totalorder %v290_v45, %v1804_v21  ;;  %vm413_vm13 = vcmp.eq.s32.totalorder %v290_v45, %v1807_v22 }
  0x48   : > { %1465 = vmatpush2.msk.msra.mxu0 %vm426_vm14, %v1670_v26  ;;  %1529 = vmatpush2.msk.msra.mxu1 %vm428_vm15, %v1670_v26  ;;  %vm410_vm14 = vcmp.eq.s32.totalorder %v290_v45, %v1810_v23  ;;  %vm412_vm15 = vcmp.eq.s32.totalorder %v290_v45, %v1813_v24 }
  0x49   : > { %1466 = vmatprep.subr.msk.mxu0 %vm423_vm0, %v1670_v26  ;;  %1530 = vmatprep.subr.msk.mxu1 %vm425_vm1, %v1670_v26  ;;  %vm407_vm0 = vcmp.eq.s32.totalorder %v289_v46, %v1804_v21  ;;  %vm409_vm1 = vcmp.eq.s32.totalorder %v289_v46, %v1807_v22 }
  0x4a   : > { %1467 = vmatpush2.msk.msra.mxu0 %vm422_vm2, %v1670_v26  ;;  %1531 = vmatpush2.msk.msra.mxu1 %vm424_vm3, %v1670_v26  ;;  %vm406_vm2 = vcmp.eq.s32.totalorder %v289_v46, %v1810_v23  ;;  %vm408_vm3 = vcmp.eq.s32.totalorder %v289_v46, %v1813_v24 }
  0x4b   : > { %1468 = vmatprep.subr.msk.mxu0 %vm419_vm4, %v1670_v26  ;;  %1532 = vmatprep.subr.msk.mxu1 %vm421_vm5, %v1670_v26  ;;  %vm403_vm4 = vcmp.eq.s32.totalorder %v288_v47, %v1804_v21  ;;  %vm405_vm5 = vcmp.eq.s32.totalorder %v288_v47, %v1807_v22 }
  0x4c   : > { %1469 = vmatpush2.msk.msra.mxu0 %vm418_vm6, %v1670_v26  ;;  %1533 = vmatpush2.msk.msra.mxu1 %vm420_vm7, %v1670_v26  ;;  %vm402_vm6 = vcmp.eq.s32.totalorder %v288_v47, %v1810_v23  ;;  %vm404_vm7 = vcmp.eq.s32.totalorder %v288_v47, %v1813_v24 }
  0x4d   : > { %1470 = vmatprep.subr.msk.mxu0 %vm415_vm8, %v1670_v26  ;;  %1534 = vmatprep.subr.msk.mxu1 %vm417_vm9, %v1670_v26  ;;  %vm399_vm8 = vcmp.eq.s32.totalorder %v287_v48, %v1804_v21  ;;  %vm401_vm9 = vcmp.eq.s32.totalorder %v287_v48, %v1807_v22 }
  0x4e   : > { %1471 = vmatpush2.msk.msra.mxu0 %vm414_vm10, %v1670_v26  ;;  %1535 = vmatpush2.msk.msra.mxu1 %vm416_vm11, %v1670_v26  ;;  %vm398_vm10 = vcmp.eq.s32.totalorder %v287_v48, %v1810_v23  ;;  %vm400_vm11 = vcmp.eq.s32.totalorder %v287_v48, %v1813_v24 }
  0x4f   : > { %1472 = vmatprep.subr.msk.mxu0 %vm411_vm12, %v1670_v26  ;;  %1536 = vmatprep.subr.msk.mxu1 %vm413_vm13, %v1670_v26  ;;  %vm395_vm12 = vcmp.eq.s32.totalorder %v286_v49, %v1804_v21  ;;  %vm397_vm13 = vcmp.eq.s32.totalorder %v286_v49, %v1807_v22 }
  0x50   : > { %1473 = vmatpush2.msk.msra.mxu0 %vm410_vm14, %v1670_v26  ;;  %1537 = vmatpush2.msk.msra.mxu1 %vm412_vm15, %v1670_v26  ;;  %vm394_vm14 = vcmp.eq.s32.totalorder %v286_v49, %v1810_v23  ;;  %vm396_vm15 = vcmp.eq.s32.totalorder %v286_v49, %v1813_v24 }
  0x51   : > { %1474 = vmatprep.subr.msk.mxu0 %vm407_vm0, %v1670_v26  ;;  %1538 = vmatprep.subr.msk.mxu1 %vm409_vm1, %v1670_v26  ;;  %vm391_vm0 = vcmp.eq.s32.totalorder %v285_v50, %v1804_v21  ;;  %vm393_vm1 = vcmp.eq.s32.totalorder %v285_v50, %v1807_v22 }
  0x52   : > { %1475 = vmatpush2.msk.msra.mxu0 %vm406_vm2, %v1670_v26  ;;  %1539 = vmatpush2.msk.msra.mxu1 %vm408_vm3, %v1670_v26  ;;  %vm390_vm2 = vcmp.eq.s32.totalorder %v285_v50, %v1810_v23  ;;  %vm392_vm3 = vcmp.eq.s32.totalorder %v285_v50, %v1813_v24 }
  0x53   : > { %1476 = vmatprep.subr.msk.mxu0 %vm403_vm4, %v1670_v26  ;;  %1540 = vmatprep.subr.msk.mxu1 %vm405_vm5, %v1670_v26  ;;  %vm387_vm4 = vcmp.eq.s32.totalorder %v284_v51, %v1804_v21  ;;  %vm389_vm5 = vcmp.eq.s32.totalorder %v284_v51, %v1807_v22 }
  0x54   : > { %1477 = vmatpush2.msk.msra.mxu0 %vm402_vm6, %v1670_v26  ;;  %1541 = vmatpush2.msk.msra.mxu1 %vm404_vm7, %v1670_v26  ;;  %vm386_vm6 = vcmp.eq.s32.totalorder %v284_v51, %v1810_v23  ;;  %vm388_vm7 = vcmp.eq.s32.totalorder %v284_v51, %v1813_v24 }
  0x55   : > { %1478 = vmatprep.subr.msk.mxu0 %vm399_vm8, %v1670_v26  ;;  %1542 = vmatprep.subr.msk.mxu1 %vm401_vm9, %v1670_v26  ;;  %vm383_vm8 = vcmp.eq.s32.totalorder %v283_v52, %v1804_v21  ;;  %vm385_vm9 = vcmp.eq.s32.totalorder %v283_v52, %v1807_v22 }
  0x56   : > { %1479 = vmatpush2.msk.msra.mxu0 %vm398_vm10, %v1670_v26  ;;  %1543 = vmatpush2.msk.msra.mxu1 %vm400_vm11, %v1670_v26  ;;  %vm382_vm10 = vcmp.eq.s32.totalorder %v283_v52, %v1810_v23  ;;  %vm384_vm11 = vcmp.eq.s32.totalorder %v283_v52, %v1813_v24 }
  0x57   : > { %1480 = vmatprep.subr.msk.mxu0 %vm395_vm12, %v1670_v26  ;;  %1544 = vmatprep.subr.msk.mxu1 %vm397_vm13, %v1670_v26  ;;  %vm379_vm12 = vcmp.eq.s32.totalorder %v282_v53, %v1804_v21  ;;  %vm381_vm13 = vcmp.eq.s32.totalorder %v282_v53, %v1807_v22  ;;  %v746_v21 = vrot.slane %v259_v9, %v1786_v12 }
  0x58   : > { %1481 = vmatpush2.msk.msra.mxu0 %vm394_vm14, %v1670_v26  ;;  %1545 = vmatpush2.msk.msra.mxu1 %vm396_vm15, %v1670_v26  ;;  %vm378_vm14 = vcmp.eq.s32.totalorder %v282_v53, %v1810_v23  ;;  %vm380_vm15 = vcmp.eq.s32.totalorder %v282_v53, %v1813_v24  ;;  %v973_v24 = vrot.slane %v262_v11, %v1789_v13 }
  0x59   : > { %1482 = vmatprep.subr.msk.mxu0 %vm391_vm0, %v1670_v26  ;;  %1546 = vmatprep.subr.msk.mxu1 %vm393_vm1, %v1670_v26  ;;  %vm1045_vm0 = vcmask 261120  }
  0x5a   : > { %1483 = vmatpush2.msk.msra.mxu0 %vm390_vm2, %v1670_v26  ;;  %1547 = vmatpush2.msk.msra.mxu1 %vm392_vm3, %v1670_v26 }
  0x5b   : > { %1484 = vmatprep.subr.msk.mxu0 %vm387_vm4, %v1670_v26  ;;  %1548 = vmatprep.subr.msk.mxu1 %vm389_vm5, %v1670_v26 }
  0x5c   : > { %1485 = vmatpush2.msk.msra.mxu0 %vm386_vm6, %v1670_v26  ;;  %1549 = vmatpush2.msk.msra.mxu1 %vm388_vm7, %v1670_v26 }
  0x5d   : > { %1486 = vmatprep.subr.msk.mxu0 %vm383_vm8, %v1670_v26  ;;  %1550 = vmatprep.subr.msk.mxu1 %vm385_vm9, %v1670_v26 }
  0x5e   : > { %1487 = vmatpush2.msk.msra.mxu0 %vm382_vm10, %v1670_v26  ;;  %1551 = vmatpush2.msk.msra.mxu1 %vm384_vm11, %v1670_v26 }
  0x5f   : > { %1488 = vmatprep.subr.msk.mxu0 %vm379_vm12, %v1670_v26  ;;  %1552 = vmatprep.subr.msk.mxu1 %vm381_vm13, %v1670_v26 }
  0x60   : > { %1489 = vmatpush2.msk.msra.mxu0 %vm378_vm14, %v1670_v26  ;;  %1553 = vmatpush2.msk.msra.mxu1 %vm380_vm15, %v1670_v26  ;;  %v981_v26 = vrot.slane %v262_v11, %v1792_v14 }
  0x61   : > { %832 = vmatmul.mubr.f32.vlgmr.msra.gmra.mxu0 %v698_v54  ;;  %921 = vmatmul.mubr.f32.vlgmr.msra.gmra.mxu1 %v698_v54 }
  0x62   : > { %837 = vmatprep.mubr.f32.mxu0 %v701_v55  ;;  %926 = vmatprep.mubr.f32.mxu1 %v701_v55 }
  0x63   : > { %951 = vperm.xlu1 %1606, %v945_v56   ;;  %956 = vperm.xlu0 %1605, %v946_v57  }
  0x65   : > { %838 = vmatmul.mubr.f32.gmra.mxu0 %v700_v58  ;;  %927 = vmatmul.mubr.f32.gmra.mxu1 %v700_v58 }
  0x66   : > { %843 = vmatprep.mubr.f32.mxu0 %v703_v59  ;;  %932 = vmatprep.mubr.f32.mxu1 %v703_v59 }
  0x67   : > { %1042 = vperm.xlu0 %1605, %v1039_v60  }
  0x69   : > { %844 = vmatmul.mubr.f32.gmra.mxu0 %v702_v61  ;;  %933 = vmatmul.mubr.f32.gmra.mxu1 %v702_v61 }
  0x6a   : > { %849 = vmatprep.mubr.f32.mxu0 %v705_v62  ;;  %938 = vmatprep.mubr.f32.mxu1 %v705_v62 }
  0x6d   : > { %850 = vmatmul.mubr.f32.gmra.mxu0 %v704_v63  ;;  %939 = vmatmul.mubr.f32.gmra.mxu1 %v704_v63 }
  0x6e   : > { %1113 = vmatprep.mubr.f32.mxu0 %v1671_v0  ;;  %1184 = vmatprep.mubr.f32.mxu1 %v1671_v0 }
  0x91   : > { %v967_v1 = vpop.permute.xlu1 %966  ;;  %v728_v4 = vpop.permute.xlu0 %727 }
  0x92   : > { %v763_v48 = vmul.f32 %v734_v18, %v728_v4  ;;  %v1002_v49 = vmul.f32 %v973_v24, %v967_v1  ;;  %v765_v50 = vmul.f32 %v742_v19, %v728_v4  ;;  %v1004_v51 = vmul.f32 %v981_v26, %v967_v1 }
  0x93   : > { %v764_v54 = vmul.f32 %v738_v20, %v728_v4  ;;  %v1003_v55 = vmul.f32 %v977_v25, %v967_v1  ;;  %v766_v56 = vmul.f32 %v746_v21, %v728_v4  ;;  %v1005_v57 = vmul.f32 %v985_v27, %v967_v1 }
  0x95   : > { %v718_v6 = vpop.permute.xlu1 %717  ;;  %v723_v10 = vpop.permute.xlu0 %722 }
  0x96   : > { %v755_v35 = vmul.f32 %v734_v18, %v718_v6  ;;  %v757_v36 = vmul.f32 %v742_v19, %v718_v6  ;;  %v756_v37 = vmul.f32 %v738_v20, %v718_v6  ;;  %v758_v13 = vmul.f32 %v746_v21, %v718_v6 }
  0x97   : > { %v759_v40 = vmul.f32 %v734_v18, %v723_v10  ;;  %v761_v41 = vmul.f32 %v742_v19, %v723_v10  ;;  %v760_v44 = vmul.f32 %v738_v20, %v723_v10  ;;  %v762_v46 = vmul.f32 %v746_v21, %v723_v10 }
  0x99   : > { %v713_v17 = vpop.permute.xlu1 %712 }
  0x9a   : > { %v962_v30 = vpop.permute.xlu0 %961  ;;  %v2147_v31 = vmul.f32 %v734_v18, %v713_v17  ;;  %v2149_v32 = vmul.f32 %v742_v19, %v713_v17  ;;  %v752_v33 = vmul.f32 %v738_v20, %v713_v17  ;;  %v754_v34 = vmul.f32 %v746_v21, %v713_v17 }
  0x9b   : > { %v998_v14 = vmul.f32 %v973_v24, %v962_v30  ;;  %v1000_v12 = vmul.f32 %v981_v26, %v962_v30  ;;  %v999_v45 = vmul.f32 %v977_v25, %v962_v30  ;;  %v1001_v47 = vmul.f32 %v985_v27, %v962_v30 }
  0x9c   : > { %2205 = vst [vmem:[#allocation7_spill] sm:$0xff] %v2149_v32 }
  0xde   : > { %v952_v8 = vpop.permute.xlu1 %951  ;;  %v957_v62 = vpop.permute.xlu0 %956 }
  0xdf   : > { %v990_v58 = vmul.f32 %v973_v24, %v952_v8  ;;  %v991_v59 = vmul.f32 %v977_v25, %v952_v8  ;;  %v992_v60 = vmul.f32 %v981_v26, %v952_v8  ;;  %v993_v61 = vmul.f32 %v985_v27, %v952_v8 }
  0xe0   : > { %v994_v63 = vmul.f32 %v973_v24, %v957_v62  ;;  %v996_v0 = vmul.f32 %v981_v26, %v957_v62  ;;  %v995_v3 = vmul.f32 %v977_v25, %v957_v62  ;;  %v997_v5 = vmul.f32 %v985_v27, %v957_v62 }
 0x121   : > { %v2135_v15 = vpop.f32.mrf.mxu0  ;;  %v2137_v16 = vpop.f32.mrf.mxu1 }
 0x122   : > { %2204 = vst [vmem:[#allocation6_spill] sm:$0xff] %v2137_v16 }
 0x123   : > { %v835_v22 = vpop.f32.mrf.mxu0  ;;  %v924_v23 = vpop.f32.mrf.mxu1 }
 0x124   : > { %v836_v18 = vadd.f32 %v835_v22, %v752_v33  ;;  %v925_v19 = vadd.f32 %v924_v23, %v754_v34  ;;  %v834_v22 = vadd.f32 %v2135_v15, %v2147_v31  ;;  %v2206_v23 = vld [vmem:[#allocation7_spill] sm:$0xff] }
 0x125   : > { %v839_v28 = vpop.f32.mrf.mxu0  ;;  %v928_v29 = vpop.f32.mrf.mxu1 }
 0x126   : > { %v840_v24 = vadd.f32 %v839_v28, %v755_v35  ;;  %v929_v26 = vadd.f32 %v928_v29, %v757_v36  ;;  %v1006_v15 = vadd.f32 %v990_v58, %v834_v22 }
 0x127   : > { %v841_v38 = vpop.f32.mrf.mxu0  ;;  %v930_v39 = vpop.f32.mrf.mxu1 }
 0x128   : > { %v842_v30 = vadd.f32 %v841_v38, %v756_v37  ;;  %v931_v2 = vadd.f32 %v930_v39, %v758_v13  ;;  %v1010_v28 = vadd.f32 %v994_v63, %v840_v24  ;;  %v1012_v29 = vadd.f32 %v996_v0, %v929_v26 }
 0x129   : > { %v845_v42 = vpop.f32.mrf.mxu0  ;;  %v934_v43 = vpop.f32.mrf.mxu1  ;;  %v2207_v33 = vld [vmem:[#allocation6_spill] sm:$0xff] }
 0x12a   : > { %v846_v20 = vadd.f32 %v845_v42, %v759_v40  ;;  %v935_v4 = vadd.f32 %v934_v43, %v761_v41  ;;  %v923_v34 = vadd.f32 %v2207_v33, %v2206_v23  ;;  %v1011_v37 = vadd.f32 %v995_v3, %v842_v30 }
 0x12b   : > { %v847_v52 = vpop.f32.mrf.mxu0  ;;  %v936_v53 = vpop.f32.mrf.mxu1  ;;  %v1013_v38 = vadd.f32 %v997_v5, %v931_v2  ;;  %v1007_v42 = vadd.f32 %v991_v59, %v836_v18  ;;  %v1009_v43 = vadd.f32 %v993_v61, %v925_v19  ;;  %v2208_v61 = vld [vmem:[#allocation5_spill] sm:$0xff] }
 0x12c   : > { %v848_v9 = vadd.f32 %v847_v52, %v760_v44  ;;  %v937_v10 = vadd.f32 %v936_v53, %v762_v46  ;;  %v1014_v40 = vadd.f32 %v998_v14, %v846_v20  ;;  %v1016_v41 = vadd.f32 %v1000_v12, %v935_v4  ;;  %v1038_v53 = vld [vmem:[%s2197_s4] sm:$0x3]  ;;  %v1043_v59 = vpop.permute.xlu0 %1042 }
 0x12d   : > { %v851_v6 = vpop.f32.mrf.mxu0  ;;  %v940_v7 = vpop.f32.mrf.mxu1  ;;  %v1008_v31 = vadd.f32 %v992_v60, %v923_v34  ;;  %v1027_v14 = vmax.f32 %v1011_v37, 0.0  ;;  %v1029_v2 = vmax.f32 %v1013_v38, 0.0  ;;  %v1026_v12 = vmax.f32 %v1010_v28, 0.0 }
 0x12e   : > { %v852_v11 = vadd.f32 %v851_v6, %v763_v48  ;;  %v941_v17 = vadd.f32 %v940_v7, %v765_v50  ;;  %v1015_v62 = vadd.f32 %v999_v45, %v848_v9  ;;  %v1017_v32 = vadd.f32 %v1001_v47, %v937_v10 }
 0x12f   : > { %v853_v1 = vpop.f32.mrf.mxu0  ;;  %v942_v21 = vpop.f32.mrf.mxu1  ;;  %v1030_v47 = vmax.f32 %v1014_v40, 0.0  ;;  %v1032_v48 = vmax.f32 %v1016_v41, 0.0  ;;  %v1023_v50 = vmax.f32 %v1007_v42, 0.0  ;;  %v1024_v52 = vmax.f32 %v1008_v31, 0.0 }
 0x130   : > { %v854_v8 = vadd.f32 %v853_v1, %v764_v54  ;;  %v943_v16 = vadd.f32 %v942_v21, %v766_v56  ;;  %v1018_v25 = vadd.f32 %v1002_v49, %v852_v11  ;;  %v1020_v27 = vadd.f32 %v1004_v51, %v941_v17 }
 0x131   : > { %v1031_v45 = vmax.f32 %v1015_v62, 0.0  ;;  %v1028_v49 = vmax.f32 %v1012_v29, 0.0  ;;  %v1025_v51 = vmax.f32 %v1009_v43, 0.0  ;;  %v1672_v54 = vmov 1983009808  }
 0x132   : > { %v1019_v44 = vadd.f32 %v1003_v55, %v854_v8  ;;  %v1021_v46 = vadd.f32 %v1005_v57, %v943_v16  ;;  %v1034_v35 = vmax.f32 %v1018_v25, 0.0  ;;  %v1036_v36 = vmax.f32 %v1020_v27, 0.0 }
 0x133   : > { %v1033_v16 = vmax.f32 %v1017_v32, 0.0  ;;  %v1022_v32 = vmax.f32 %v1006_v15, 0.0  ;;  %v1198_v55 = vunpack.c.l.s4 %v1672_v54 }
 0x134   : > { %v1035_v13 = vmax.f32 %v1019_v44, 0.0  ;;  %v1037_v39 = vmax.f32 %v1021_v46, 0.0 }
 0x135   : > { %v1199_v56 = vunpack.c.0.s8 %v1198_v55 }
 0x136   : > { %1073 = vmatprep.subr.mxu0 %v1035_v13  ;;  %1144 = vmatprep.subr.mxu1 %v1037_v39 }
 0x137   : > { %1074 = vmatpush1.msra.mxu0 %v1034_v35  ;;  %1145 = vmatpush1.msra.mxu1 %v1036_v36  ;;  %v1202_v63 = vsub.s32 %v1199_v56, %v2208_v61 }
 0x138   : > { %1075 = vmatprep.subr.mxu0 %v1031_v45  ;;  %1146 = vmatprep.subr.mxu1 %v1033_v16 }
 0x139   : > { %1076 = vmatpush1.msra.mxu0 %v1030_v47  ;;  %1147 = vmatpush1.msra.mxu1 %v1032_v48 }
 0x13a   : > { %1077 = vmatprep.subr.mxu0 %v1027_v14  ;;  %1148 = vmatprep.subr.mxu1 %v1029_v2 }
 0x13b   : > { %1078 = vmatpush1.msra.mxu0 %v1026_v12  ;;  %1149 = vmatpush1.msra.mxu1 %v1028_v49 }
 0x13c   : > { %1079 = vmatprep.subr.mxu0 %v1023_v50  ;;  %1150 = vmatprep.subr.mxu1 %v1025_v51 }
 0x13d   : > { %1080 = vmatpush1.msra.mxu0 %v1022_v32  ;;  %1151 = vmatpush1.msra.mxu1 %v1024_v52 }
 0x13e   : > { %1554 = vmatmul.mubr.msk.f32.vlgmr.msra.gmra.mxu0 %vm1045_vm0, %v1038_v53  ;;  %1555 = vmatmul.mubr.msk.f32.vlgmr.msra.gmra.mxu1 %vm1045_vm0, %v1038_v53 }
 0x1fe   : > { %v1115_v57 = vpop.f32.mrf.mxu0  ;;  %v1186_v58 = vpop.f32.mrf.mxu1 }
 0x1ff   : > { %v1116_v3 = vadd.f32 %v1115_v57, %v1043_v59  ;;  %v1187_v5 = vadd.f32 %v1186_v58, %v1043_v59 }
 0x200   : > { %v1117_v60 = vpop.f32.mrf.mxu0  ;;  %v1188_v0 = vpop.f32.mrf.mxu1 }
 0x201   : > { %v1118_v6 = vadd.f32 %v1117_v60, %v1043_v59  ;;  %v1189_v7 = vadd.f32 %v1188_v0, %v1043_v59 }
 0x203   : > { %v1195_v9 = vcombine.low %v1116_v3, %v1118_v6  ;;  %v1196_v10 = vcombine.low %v1187_v5, %v1189_v7 }
 0x205   : > { %v1203_v11 = vrot.slane %v1195_v9, %v1202_v63  ;;  %v1210_v17 = vrot.slane %v1196_v10, %v1202_v63 }
 0x207   : > { %v1211_v18 = vcombine.low %v1203_v11, %v1210_v17 }
 0x209   : > { %1213 = vst [vmem:[%s245_s9] sm:$0xff] %v1211_v18 }
 0x20a   : > { %1620 = shalt.err (!%p1617_p3)
}
 0x20b   : > { %s1621_s18 = scalar_lea.hbm %s1227_s13, 128  ;;  %s1625_s20 = scalar_lea.hbm %s2199_s6, 256 }
 0x20c   : > { %p1622_p4 = scmp.ne.s32.totalorder %s1227_s13, %s1621_s18  ;;  %p1626_p9 = scmp.lt.s32.totalorder %s1227_s13, %s2199_s6 }
 0x20d   : > { %p1627_p10 = scmp.lt.s32.totalorder %s1625_s20, %s1621_s18 }
 0x20e   : > { %p1623_p7 = pnand %p1622_p4, %p1747_p5 }
 0x20f   : > { %p1628_p11 = por %p1627_p10, %p1626_p9 }
 0x210   : > { %p1624_p8 = pneg %p1623_p7 }
 0x212   : > { %p1629_p12 = pnand %p1628_p11, %p1624_p8 }
 0x214   : > { %1632 = shalt.err (!%p1629_p12)
}
 0x215   : > { %1562 = dma.vmem_to_hbm [thread:$0]  (%p1747_p5), %s1230_s10, 128, %s1227_s13, %s1215_s14  }
 0x216 PF: > { %p1568_p13 = scmp.ge.s32.totalorder %s1667_s24, 2  ;;  %s1241_s9 = sand.u32 1, %s1655_s21  }
 0x217   : > { %s1242_s11 = scalar_lea.sflag [#allocation3], %s1241_s9 }
 0x218   : > { %p1565_p0 = pnand %p1568_p13, %p1751_p6 }
 0x21a   : > { %p1566_p1 = pneg %p1565_p0 }
 0x21c   : > { %1650 = dma.done.wait (%p1566_p1), %s1242_s11, 128  }
 0x21d   : > { %1652 = vsyncadd (%p1566_p1), %s1242_s11, 4294967168  ;;  %p16_p2 = scmp.ge.s32.totalorder %s1734_s27, 4   ;;  %s2209_s21 = smov %s1659_s22 }
 0x21e   : > { %s2210_s22 = smov %s1663_s23  ;;  %s2211_s23 = smov %s1745_s30 }
 0x21f   : > { %s2212_s24 = smov %s1734_s27  ;;  %18 = sbr.rel (!%p16_p2) target bundleno = 3 (0x3), region = 82 }
 0x224   :  { %1247 = vsyncpa [#allocation3], 1 }
 0x225   :  { %1249 = vsyncpa [#allocation3 + $0x1], 1 }

</bundles_post_ra>
